<compile_context>
chip_gen: v7x
topology: tpu7x:2x2x1
jax: 0.10.0
libtpu: 0.0.40
codegen_flags: <defaults>
</compile_context>

<pallas_src>
import jax
import jax.numpy as jnp
from jax.experimental import pallas as pl
from jax.experimental.pallas import tpu as pltpu

GROUP = 16          # batch items packed per 128-lane row (16 * 8 features = 128)
FEAT_IN = 8


def _sigmoid(x):
    # Single-transcendental sigmoid: sigmoid(x) == 0.5 * tanh(x/2) + 0.5
    return 0.5 * jnp.tanh(0.5 * x) + 0.5


def _mlp_kernel(x_ref, w1_ref, b1_ref, w2_ref, b2_ref, w3_ref, b3_ref, o_ref):
    # x_ref: [TG, 128]  (each row = 16 batch items x 8 features, interleaved)
    # w*_ref: block-diagonal weights; b*_ref: [1, N] tiled biases.
    x = x_ref[...]
    h1 = _sigmoid(
        jnp.dot(x, w1_ref[...], preferred_element_type=jnp.float32) + b1_ref[...]
    )  # [TG, 96]
    h2 = _sigmoid(
        jnp.dot(h1, w2_ref[...], preferred_element_type=jnp.float32) + b2_ref[...]
    )  # [TG, 64]
    y = _sigmoid(
        jnp.dot(h2, w3_ref[...], preferred_element_type=jnp.float32) + b3_ref[...]
    )  # [TG, 16]  (lane j = batch item j within the 16-group)
    o_ref[...] = y.astype(o_ref.dtype)


def mlp_forward(x, w1, b1, w2, b2, w3, b3, *, tile_b=65536):
    """x: [B, 8] f32; w_i: [in, out]; b_i: [out]  ->  [B, 1] f32."""
    B, D = x.shape
    assert D == FEAT_IN, f"expected {FEAT_IN} input features, got {D}"

    # Pad batch only to a multiple of 16 (needed for the free [B,8]->[B/16,128]
    # view). This is a no-op for the common case B % 16 == 0.
    b16 = pl.cdiv(B, GROUP) * GROUP
    x16 = jnp.pad(x, ((0, b16 - B), (0, 0))) if b16 != B else x
    G = b16 // GROUP
    x2 = x16.reshape(G, GROUP * FEAT_IN)  # [G, 128], row-major => pure metadata reshape

    # Rows per grid step: multiple of 8 sublanes (=> tile_b multiple of 128),
    # capped so the grid has >= 2 steps whenever G allows it (keeps both v7x
    # TensorCores busy while still amortizing per-step overhead).
    tg_req = max(8, (int(tile_b) // GROUP) // 8 * 8)
    tg_cap = max(8, pl.cdiv(G, 2 * 8) * 8)
    tg = min(tg_req, tg_cap)
    grid = (pl.cdiv(G, tg),)

    # Fold the batch interleave into block-diagonal weights (built once, tiny):
    #   Wb1[8j+f, 6j'+o] = w1[f, o] * (j == j'), etc.
    eye = jnp.eye(GROUP, dtype=jnp.float32)
    wb1 = jnp.kron(eye, w1.astype(jnp.float32))                 # [128, 96]
    wb2 = jnp.kron(eye, w2.astype(jnp.float32))                 # [96, 64]
    wb3 = jnp.kron(eye, w3.astype(jnp.float32))                 # [64, 16]
    bb1 = jnp.tile(b1.astype(jnp.float32), GROUP).reshape(1, -1)  # [1, 96]
    bb2 = jnp.tile(b2.astype(jnp.float32), GROUP).reshape(1, -1)  # [1, 64]
    bb3 = jnp.tile(b3.astype(jnp.float32), GROUP).reshape(1, -1)  # [1, 16]

    # Tiny weights/biases: full blocks, constant index map -> stay resident in VMEM.
    const = lambda a: pl.BlockSpec(a.shape, lambda i: (0, 0))

    y2 = pl.pallas_call(
        _mlp_kernel,
        out_shape=jax.ShapeDtypeStruct((G, GROUP), jnp.float32),
        grid=grid,
        in_specs=[
            pl.BlockSpec((tg, GROUP * FEAT_IN), lambda i: (i, 0)),  # x tile
            const(wb1), const(bb1),
            const(wb2), const(bb2),
            const(wb3), const(bb3),
        ],
        out_specs=pl.BlockSpec((tg, GROUP), lambda i: (i, 0)),
        compiler_params=pltpu.CompilerParams(
            dimension_semantics=("parallel",),
            vmem_limit_bytes=32 * 1024 * 1024,
        ),
    )(x2, wb1, bb1, wb2, bb2, wb3, bb3)

    # [G, 16] row-major == batch order; drop padded items, return [B, 1].
    return y2.reshape(-1)[:B].reshape(B, 1)


def init_params(key):
    """Deterministic init mimicking nn.Linear's U(-1/sqrt(fan_in), 1/sqrt(fan_in))."""
    dims = [(8, 6), (6, 4), (4, 1)]
    params = []
    for i, (fan_in, fan_out) in enumerate(dims):
        kw, kb, key = jax.random.split(jax.random.fold_in(key, i), 3)
        bound = 1.0 / jnp.sqrt(float(fan_in))
        # Stored as [in, out] (transposed vs. PyTorch's [out, in]).
        w = jax.random.uniform(kw, (fan_in, fan_out), jnp.float32, -bound, bound)
        b = jax.random.uniform(kb, (fan_out,), jnp.float32, -bound, bound)
        params += [w, b]
    return params


def _reference(x, w1, b1, w2, b2, w3, b3):
    h1 = jax.nn.sigmoid(x @ w1 + b1)
    h2 = jax.nn.sigmoid(h1 @ w2 + b2)
    return jax.nn.sigmoid(h2 @ w3 + b3)


if __name__ == "__main__":
    key = jax.random.PRNGKey(0)
    kx, kp = jax.random.split(key)
    w1, b1, w2, b2, w3, b3 = init_params(kp)

    # Small batch (single tile; exercises the B % 16 != 0 pad-to-16 path).
    batch = 8
    x = jax.random.normal(kx, (batch, 8), dtype=jnp.float32)
    y = mlp_forward(x, w1, b1, w2, b2, w3, b3)
    jax.block_until_ready(y)
    y_ref = _reference(x, w1, b1, w2, b2, w3, b3)
    assert y.shape == (batch, 1)
    assert jnp.allclose(y, y_ref, atol=1e-5), "mismatch vs reference (small batch)"

    # Ragged multi-tile (exercises the grid + Pallas-masked last block path).
    batch2 = 300
    x2 = jax.random.normal(jax.random.fold_in(kx, 1), (batch2, 8), dtype=jnp.float32)
    y2 = mlp_forward(x2, w1, b1, w2, b2, w3, b3, tile_b=256)
    jax.block_until_ready(y2)
    y2_ref = _reference(x2, w1, b1, w2, b2, w3, b3)
    assert y2.shape == (batch2, 1)
    assert jnp.allclose(y2, y2_ref, atol=1e-5), "mismatch vs reference (multi-tile)"

    print("KERNEL_OK")
</pallas_src>

<mosaic_0001>
module attributes {stable_mosaic.version = 11 : i64} {
  func.func @_mlp_kernel(%arg0: i32, %arg1: memref<8x128xf32, #tpu.memory_space<vmem>>, %arg2: memref<128x96xf32, #tpu.memory_space<vmem>>, %arg3: memref<1x96xf32, #tpu.memory_space<vmem>>, %arg4: memref<96x64xf32, #tpu.memory_space<vmem>>, %arg5: memref<1x64xf32, #tpu.memory_space<vmem>>, %arg6: memref<64x16xf32, #tpu.memory_space<vmem>>, %arg7: memref<1x16xf32, #tpu.memory_space<vmem>>, %arg8: memref<8x16xf32, #tpu.memory_space<vmem>>) attributes {dimension_semantics = [#tpu.dimension_semantics<parallel>], iteration_bounds = array<i64: 1>, scalar_prefetch = 0 : i64, scratch_operands = 0 : i64, tpu.core_type = #tpu.core_type<tc>, window_params = [{transform_indices = @transform_0, window_bounds = array<i64: 8, 128>}, {pipeline_mode = #tpu.pipeline_mode<synchronous>, transform_indices = @transform_1, window_bounds = array<i64: 128, 96>}, {pipeline_mode = #tpu.pipeline_mode<synchronous>, transform_indices = @transform_2, window_bounds = array<i64: 1, 96>}, {pipeline_mode = #tpu.pipeline_mode<synchronous>, transform_indices = @transform_3, window_bounds = array<i64: 96, 64>}, {pipeline_mode = #tpu.pipeline_mode<synchronous>, transform_indices = @transform_4, window_bounds = array<i64: 1, 64>}, {pipeline_mode = #tpu.pipeline_mode<synchronous>, transform_indices = @transform_5, window_bounds = array<i64: 64, 16>}, {pipeline_mode = #tpu.pipeline_mode<synchronous>, transform_indices = @transform_6, window_bounds = array<i64: 1, 16>}, {transform_indices = @transform_7, window_bounds = array<i64: 8, 16>}]} {
    %c0 = arith.constant 0 : index
    %c0_0 = arith.constant 0 : index
    %0 = vector.load %arg1[%c0, %c0_0] : memref<8x128xf32, #tpu.memory_space<vmem>>, vector<8x128xf32>
    %c0_1 = arith.constant 0 : index
    %c0_2 = arith.constant 0 : index
    %1 = vector.load %arg2[%c0_1, %c0_2] : memref<128x96xf32, #tpu.memory_space<vmem>>, vector<128x96xf32>
    %cst = arith.constant dense<0.000000e+00> : vector<8x96xf32>
    %2 = tpu.matmul %0, %1, %cst {dimension_numbers = #tpu.dot_dimension_numbers<[1], [0], [0], [1], [0, 0, 1, 1], [], []>} : vector<8x128xf32>, vector<128x96xf32>, vector<8x96xf32> -> vector<8x96xf32>
    %c0_3 = arith.constant 0 : index
    %c0_4 = arith.constant 0 : index
    %3 = vector.load %arg3[%c0_3, %c0_4] : memref<1x96xf32, #tpu.memory_space<vmem>>, vector<1x96xf32>
    %4 = vector.broadcast %3 : vector<1x96xf32> to vector<8x96xf32>
    %5 = arith.addf %2, %4 : vector<8x96xf32>
    %cst_5 = arith.constant 5.000000e-01 : f32
    %6 = vector.broadcast %cst_5 : f32 to vector<8x96xf32>
    %7 = arith.mulf %6, %5 : vector<8x96xf32>
    %8 = math.tanh %7 : vector<8x96xf32>
    %cst_6 = arith.constant 5.000000e-01 : f32
    %9 = vector.broadcast %cst_6 : f32 to vector<8x96xf32>
    %10 = arith.mulf %9, %8 : vector<8x96xf32>
    %cst_7 = arith.constant 5.000000e-01 : f32
    %11 = vector.broadcast %cst_7 : f32 to vector<8x96xf32>
    %12 = arith.addf %10, %11 : vector<8x96xf32>
    %c0_8 = arith.constant 0 : index
    %c0_9 = arith.constant 0 : index
    %13 = vector.load %arg4[%c0_8, %c0_9] : memref<96x64xf32, #tpu.memory_space<vmem>>, vector<96x64xf32>
    %cst_10 = arith.constant dense<0.000000e+00> : vector<8x64xf32>
    %14 = tpu.matmul %12, %13, %cst_10 {dimension_numbers = #tpu.dot_dimension_numbers<[1], [0], [0], [1], [0, 0, 1, 1], [], []>} : vector<8x96xf32>, vector<96x64xf32>, vector<8x64xf32> -> vector<8x64xf32>
    %c0_11 = arith.constant 0 : index
    %c0_12 = arith.constant 0 : index
    %15 = vector.load %arg5[%c0_11, %c0_12] : memref<1x64xf32, #tpu.memory_space<vmem>>, vector<1x64xf32>
    %16 = vector.broadcast %15 : vector<1x64xf32> to vector<8x64xf32>
    %17 = arith.addf %14, %16 : vector<8x64xf32>
    %cst_13 = arith.constant 5.000000e-01 : f32
    %18 = vector.broadcast %cst_13 : f32 to vector<8x64xf32>
    %19 = arith.mulf %18, %17 : vector<8x64xf32>
    %20 = math.tanh %19 : vector<8x64xf32>
    %cst_14 = arith.constant 5.000000e-01 : f32
    %21 = vector.broadcast %cst_14 : f32 to vector<8x64xf32>
    %22 = arith.mulf %21, %20 : vector<8x64xf32>
    %cst_15 = arith.constant 5.000000e-01 : f32
    %23 = vector.broadcast %cst_15 : f32 to vector<8x64xf32>
    %24 = arith.addf %22, %23 : vector<8x64xf32>
    %c0_16 = arith.constant 0 : index
    %c0_17 = arith.constant 0 : index
    %25 = vector.load %arg6[%c0_16, %c0_17] : memref<64x16xf32, #tpu.memory_space<vmem>>, vector<64x16xf32>
    %cst_18 = arith.constant dense<0.000000e+00> : vector<8x16xf32>
    %26 = tpu.matmul %24, %25, %cst_18 {dimension_numbers = #tpu.dot_dimension_numbers<[1], [0], [0], [1], [0, 0, 1, 1], [], []>} : vector<8x64xf32>, vector<64x16xf32>, vector<8x16xf32> -> vector<8x16xf32>
    %c0_19 = arith.constant 0 : index
    %c0_20 = arith.constant 0 : index
    %27 = vector.load %arg7[%c0_19, %c0_20] : memref<1x16xf32, #tpu.memory_space<vmem>>, vector<1x16xf32>
    %28 = vector.broadcast %27 : vector<1x16xf32> to vector<8x16xf32>
    %29 = arith.addf %26, %28 : vector<8x16xf32>
    %cst_21 = arith.constant 5.000000e-01 : f32
    %30 = vector.broadcast %cst_21 : f32 to vector<8x16xf32>
    %31 = arith.mulf %30, %29 : vector<8x16xf32>
    %32 = math.tanh %31 : vector<8x16xf32>
    %cst_22 = arith.constant 5.000000e-01 : f32
    %33 = vector.broadcast %cst_22 : f32 to vector<8x16xf32>
    %34 = arith.mulf %33, %32 : vector<8x16xf32>
    %cst_23 = arith.constant 5.000000e-01 : f32
    %35 = vector.broadcast %cst_23 : f32 to vector<8x16xf32>
    %36 = arith.addf %34, %35 : vector<8x16xf32>
    %c0_24 = arith.constant 0 : index
    %c0_25 = arith.constant 0 : index
    %37 = vector.load %arg8[%c0_24, %c0_25] : memref<8x16xf32, #tpu.memory_space<vmem>>, vector<8x16xf32>
    tpu.vector_store %arg8[%c0_24, %c0_25], %36 {strides = array<i32>} : memref<8x16xf32, #tpu.memory_space<vmem>>, vector<8x16xf32>,
    return
  }
  func.func @transform_0(%arg0: i32) -> (i32, i32) {
    %c0_i32 = arith.constant 0 : i32
    %c0_i32_0 = arith.constant 0 : i32
    return %arg0, %c0_i32 : i32, i32
  }
  func.func @transform_1(%arg0: i32) -> (i32, i32) {
    %c0_i32 = arith.constant 0 : i32
    %c0_i32_0 = arith.constant 0 : i32
    %c0_i32_1 = arith.constant 0 : i32
    return %c0_i32, %c0_i32_0 : i32, i32
  }
  func.func @transform_2(%arg0: i32) -> (i32, i32) {
    %c0_i32 = arith.constant 0 : i32
    %c0_i32_0 = arith.constant 0 : i32
    %c0_i32_1 = arith.constant 0 : i32
    return %c0_i32, %c0_i32_0 : i32, i32
  }
  func.func @transform_3(%arg0: i32) -> (i32, i32) {
    %c0_i32 = arith.constant 0 : i32
    %c0_i32_0 = arith.constant 0 : i32
    %c0_i32_1 = arith.constant 0 : i32
    return %c0_i32, %c0_i32_0 : i32, i32
  }
  func.func @transform_4(%arg0: i32) -> (i32, i32) {
    %c0_i32 = arith.constant 0 : i32
    %c0_i32_0 = arith.constant 0 : i32
    %c0_i32_1 = arith.constant 0 : i32
    return %c0_i32, %c0_i32_0 : i32, i32
  }
  func.func @transform_5(%arg0: i32) -> (i32, i32) {
    %c0_i32 = arith.constant 0 : i32
    %c0_i32_0 = arith.constant 0 : i32
    %c0_i32_1 = arith.constant 0 : i32
    return %c0_i32, %c0_i32_0 : i32, i32
  }
  func.func @transform_6(%arg0: i32) -> (i32, i32) {
    %c0_i32 = arith.constant 0 : i32
    %c0_i32_0 = arith.constant 0 : i32
    %c0_i32_1 = arith.constant 0 : i32
    return %c0_i32, %c0_i32_0 : i32, i32
  }
  func.func @transform_7(%arg0: i32) -> (i32, i32) {
    %c0_i32 = arith.constant 0 : i32
    %c0_i32_0 = arith.constant 0 : i32
    return %arg0, %c0_i32 : i32, i32
  }
}

</mosaic_0001>

<bundles_post_ra>
// kernel: tpu_custom_call.1
= control target key start
LH: loop header
LB: loop body
LE: loop exit
PB: predicated region body
PF: predicated region fallthrough
CT: control target
= control target key end

     0   :  { %12 = vsyncpa [#allocation3], 0  ;;  %v548_v2 = vmov 0.0|0.0   ;;  %vm549_vm0 = vmmov 0   ;;  %v550_v6 = vmov 0.0   ;;  %vm144_vm1 = vcmask 785408   ;;  %s750_s0 = inlined_call_operand.vmem [shape: f32[1,128], index: 0, kind: input, shape index: {}]   ;;  %s751_s1 = inlined_call_operand.vmem [shape: f32[128,96], index: 1, kind: input, shape index: {}]   ;;  %s752_s2 = inlined_call_operand.vmem [shape: f32[1,96], index: 2, kind: input, shape index: {}]   ;;  %s753_s3 = inlined_call_operand.vmem [shape: f32[96,64], index: 3, kind: input, shape index: {}]   ;;  %s754_s4 = inlined_call_operand.vmem [shape: f32[1,64], index: 4, kind: input, shape index: {}]   ;;  %s755_s5 = inlined_call_operand.vmem [shape: f32[64,16], index: 5, kind: input, shape index: {}]   ;;  %s756_s6 = inlined_call_operand.vmem [shape: f32[1,16], index: 6, kind: input, shape index: {}]   ;;  %s757_s7 = inlined_call_operand.hbm [shape: f32[1,16], index: 7, kind: output, shape index: {}]  }
   0x1   :  { %v28_v0 = vld [vmem:[%s751_s1] sm:$0xff]  ;;  %v29_v1 = vld [vmem:[%s751_s1 + $0x8] sm:$0xff]  ;;  %458 = vmatprep.subr.bf16.mxu0 %v548_v2  ;;  %v30_v4 = vld [vmem:[%s751_s1 + $0x10] sm:$0xff]  ;;  %482 = vmatprep.subr.bf16.mxu1 %v548_v2  ;;  %vm237_vm2 = vcmask 523264   ;;  %vm315_vm3 = vcmask 130048  }
   0x2   :  { %v459_v3 = vpack.c.bf16 %v29_v1, %v28_v0  ;;  %v31_v5 = vld [vmem:[%s751_s1 + $0x18] sm:$0xff]  ;;  %409 = vmatprep.mubr.msk.f32.mxu0 %vm549_vm0, %v550_v6  ;;  %436 = vmatprep.mubr.msk.f32.mxu1 %vm549_vm0, %v550_v6  ;;  %v32_v8 = vld [vmem:[%s751_s1 + $0x20] sm:$0xff]  ;;  %v33_v9 = vld [vmem:[%s751_s1 + $0x28] sm:$0xff] }
   0x3   :  { %v462_v7 = vpack.c.bf16 %v31_v5, %v30_v4  ;;  %v125_v10 = vld [vmem:[%s753_s3] sm:$0xff]  ;;  %v126_v11 = vld [vmem:[%s753_s3 + $0x8] sm:$0xff]  ;;  %v465_v12 = vpack.c.bf16 %v33_v9, %v32_v8  ;;  %v34_v14 = vld [vmem:[%s751_s1 + $0x30] sm:$0xff] }
   0x4   :  { %460 = vmatpush3.bf16.msra.mxu0 %v459_v3  ;;  %v483_v13 = vpack.c.bf16 %v126_v11, %v125_v10  ;;  %v35_v15 = vld [vmem:[%s751_s1 + $0x38] sm:$0xff]  ;;  %v36_v17 = vld [vmem:[%s751_s1 + $0x40] sm:$0xff]  ;;  %v37_v18 = vld [vmem:[%s751_s1 + $0x48] sm:$0xff] }
   0x5   :  { %461 = vmatprep.subr.bf16.mxu0 %v548_v2  ;;  %v468_v16 = vpack.c.bf16 %v35_v15, %v34_v14  ;;  %v471_v19 = vpack.c.bf16 %v37_v18, %v36_v17  ;;  %v38_v20 = vld [vmem:[%s751_s1 + $0x50] sm:$0xff]  ;;  %v39_v21 = vld [vmem:[%s751_s1 + $0x58] sm:$0xff]  ;;  %v40_v23 = vld [vmem:[%s751_s1 + $0x60] sm:$0xff] }
   0x6   :  { %484 = vmatpush3.bf16.msra.mxu1 %v483_v13  ;;  %v474_v22 = vpack.c.bf16 %v39_v21, %v38_v20  ;;  %v41_v24 = vld [vmem:[%s751_s1 + $0x68] sm:$0xff]  ;;  %v42_v26 = vld [vmem:[%s751_s1 + $0x70] sm:$0xff]  ;;  %v43_v27 = vld [vmem:[%s751_s1 + $0x78] sm:$0xff] }
   0x7   :  { %485 = vmatprep.subr.bf16.mxu1 %v548_v2  ;;  %v477_v25 = vpack.c.bf16 %v41_v24, %v40_v23  ;;  %v480_v28 = vpack.c.bf16 %v43_v27, %v42_v26  ;;  %v27_v29 = vld [vmem:[%s750_s0] sm:$0xff]  ;;  %v127_v30 = vld [vmem:[%s753_s3 + $0x10] sm:$0xff]  ;;  %v128_v31 = vld [vmem:[%s753_s3 + $0x18] sm:$0xff] }
   0x8   :  { %463 = vmatpush3.bf16.msra.mxu0 %v462_v7  ;;  %v486_v32 = vpack.c.bf16 %v128_v31, %v127_v30  ;;  %v129_v33 = vld [vmem:[%s753_s3 + $0x20] sm:$0xff]  ;;  %v130_v34 = vld [vmem:[%s753_s3 + $0x28] sm:$0xff]  ;;  %v131_v36 = vld [vmem:[%s753_s3 + $0x30] sm:$0xff] }
   0x9   :  { %464 = vmatprep.subr.bf16.mxu0 %v548_v2  ;;  %v489_v35 = vpack.c.bf16 %v130_v34, %v129_v33  ;;  %v132_v37 = vld [vmem:[%s753_s3 + $0x38] sm:$0xff]  ;;  %v133_v39 = vld [vmem:[%s753_s3 + $0x40] sm:$0xff]  ;;  %v134_v40 = vld [vmem:[%s753_s3 + $0x48] sm:$0xff] }
   0xa   :  { %487 = vmatpush3.bf16.msra.mxu1 %v486_v32  ;;  %v492_v38 = vpack.c.bf16 %v132_v37, %v131_v36  ;;  %v495_v41 = vpack.c.bf16 %v134_v40, %v133_v39  ;;  %v135_v42 = vld [vmem:[%s753_s3 + $0x50] sm:$0xff]  ;;  %v136_v43 = vld [vmem:[%s753_s3 + $0x58] sm:$0xff]  ;;  %v333_v45 = vld [vmem:[%s752_s2] ss:$0 sm:$0xff] }
   0xb   :  { %488 = vmatprep.subr.bf16.mxu1 %v548_v2  ;;  %v498_v44 = vpack.c.bf16 %v136_v43, %v135_v42  ;;  %v222_v53 = vld [vmem:[%s755_s5] sm:$0xff]  ;;  %v223_v54 = vld [vmem:[%s755_s5 + $0x8] sm:$0xff]  ;;  %v224_v56 = vld [vmem:[%s755_s5 + $0x10] sm:$0xff] }
   0xc   :  { %466 = vmatpush3.bf16.msra.mxu0 %v465_v12  ;;  %v501_v55 = vpack.c.bf16 %v223_v54, %v222_v53  ;;  %v225_v57 = vld [vmem:[%s755_s5 + $0x18] sm:$0xff]  ;;  %v226_v59 = vld [vmem:[%s755_s5 + $0x20] sm:$0xff]  ;;  %v227_v60 = vld [vmem:[%s755_s5 + $0x28] sm:$0xff] }
   0xd   :  { %467 = vmatprep.subr.bf16.mxu0 %v548_v2  ;;  %v504_v58 = vpack.c.bf16 %v225_v57, %v224_v56  ;;  %v507_v61 = vpack.c.bf16 %v227_v60, %v226_v59  ;;  %v228_v62 = vld [vmem:[%s755_s5 + $0x30] sm:$0xff]  ;;  %v229_v63 = vld [vmem:[%s755_s5 + $0x38] sm:$0xff]  ;;  %v334_v1 = vld [vmem:[%s754_s4] ss:$0 sm:$0xff] }
   0xe   :  { %490 = vmatpush3.bf16.msra.mxu1 %v489_v35  ;;  %v510_v0 = vpack.c.bf16 %v229_v63, %v228_v62  ;;  %v336_v9 = vld [vmem:[%s756_s6] ss:$0 sm:$0xff] }
   0xf   :  { %491 = vmatprep.subr.bf16.mxu1 %v548_v2 }
  0x10   :  { %469 = vmatpush3.bf16.msra.mxu0 %v468_v16 }
  0x11   :  { %470 = vmatprep.subr.bf16.mxu0 %v548_v2 }
  0x12   :  { %493 = vmatpush3.bf16.msra.mxu1 %v492_v38 }
  0x13   :  { %494 = vmatprep.subr.bf16.mxu1 %v548_v2 }
  0x14   :  { %472 = vmatpush3.bf16.msra.mxu0 %v471_v19 }
  0x15   :  { %473 = vmatprep.subr.bf16.mxu0 %v548_v2 }
  0x16   :  { %496 = vmatpush3.bf16.msra.mxu1 %v495_v41 }
  0x17   :  { %497 = vmatprep.subr.bf16.mxu1 %v548_v2 }
  0x18   :  { %475 = vmatpush3.bf16.msra.mxu0 %v474_v22 }
  0x19   :  { %476 = vmatprep.subr.bf16.mxu0 %v548_v2 }
  0x1a   :  { %499 = vmatpush3.bf16.msra.mxu1 %v498_v44 }
  0x1b   :  { %500 = vmatprep.subr.bf16.mxu1 %v548_v2 }
  0x1c   :  { %478 = vmatpush3.bf16.msra.mxu0 %v477_v25 }
  0x1d   :  { %479 = vmatprep.subr.bf16.mxu0 %v548_v2 }
  0x20   :  { %481 = vmatpush3.bf16.msra.mxu0 %v480_v28 }
  0x23   :  { %410 = vmatmul.mubr.f32.vlgmr.msra.gmra.mrb[0].mxu0 %v27_v29 }
  0xf6   :  { %v117_v46 = vpop.f32.mrb[0].mxu0 }
  0xf7   :  { %v118_v47 = vadd.f32 %v333_v45, %v117_v46  ;;  %v411_v48 = vpop.f32.mrb[1].mxu0 }
  0xf9   :  { %v121_v49 = vmul.f32 0.5, %v118_v47 }
  0xfb   :  { %518 = vtanh.f32 %v121_v49 }
 0x105   :  { %v519_v50 = vpop.eup %518 }
 0x106   :  { %v123_v51 = vmul.f32 0.5, %v519_v50 }
 0x108   :  { %v124_v52 = vadd.f32 0.5, %v123_v51 }
 0x10a   :  { %437 = vmatmul.mubr.msk.f32.vlgmr.msra.gmra.mrb[0].mxu1 %vm144_vm1, %v124_v52 }
 0x10b   :  { %455 = vmatprep.mubr.msk.f32.mxu1 %vm549_vm0, %v550_v6  ;;  %502 = vmatpush3.bf16.msra.mxu1 %v501_v55 }
 0x10c   :  { %503 = vmatprep.subr.bf16.mxu1 %v548_v2 }
 0x10f   :  { %505 = vmatpush3.bf16.msra.mxu1 %v504_v58 }
 0x110   :  { %506 = vmatprep.subr.bf16.mxu1 %v548_v2 }
 0x113   :  { %508 = vmatpush3.bf16.msra.mxu1 %v507_v61 }
 0x114   :  { %509 = vmatprep.subr.bf16.mxu1 %v548_v2 }
 0x117   :  { %511 = vmatpush3.bf16.msra.mxu1 %v510_v0 }
 0x1dd   :  { %v214_v3 = vpop.f32.mrb[0].mxu1 }
 0x1de   :  { %v215_v4 = vadd.f32 %v334_v1, %v214_v3  ;;  %v438_v5 = vpop.f32.mrb[1].mxu1 }
 0x1e0   :  { %v218_v6 = vmul.f32 0.5, %v215_v4 }
 0x1e2   :  { %520 = vtanh.f32 %v218_v6 }
 0x1ec   :  { %v521_v2 = vpop.eup %520 }
 0x1ed   :  { %v220_v7 = vmul.f32 0.5, %v521_v2 }
 0x1ef   :  { %v221_v8 = vadd.f32 0.5, %v220_v7 }
 0x1f1   :  { %456 = vmatmul.mubr.msk.f32.vlgmr.msra.gmra.mrb[2].mxu1 %vm237_vm2, %v221_v8 }
 0x2c4   :  { %v307_v10 = vpop.f32.mrb[2].mxu1 }
 0x2c5   :  { %v308_v11 = vadd.f32 %v336_v9, %v307_v10  ;;  %v457_v12 = vpop.f32.mrb[3].mxu1 }
 0x2c7   :  { %v311_v13 = vmul.f32 0.5, %v308_v11 }
 0x2c9   :  { %522 = vtanh.f32 %v311_v13 }
 0x2d3   :  { %v523_v14 = vpop.eup %522 }
 0x2d4   :  { %v313_v15 = vmul.f32 0.5, %v523_v14 }
 0x2d6   :  { %v314_v16 = vadd.f32 0.5, %v313_v15 }
 0x2d8   :  { %316 = vst.msk [vmem:[#allocation2] sm:$0xff] %vm315_vm3, %v314_v16 }
 0x2d9   :  { %321 = vsyncadd [#allocation3], 112  ;;  %s551_s4 = smov [#allocation2]  }
 0x2da   :  { %s322_s5 = sshll.u32 %s551_s4, 4  ;;  %s323_s5 = int_to_ptr.vmem [resolvable:$true] %s322_s5 }
 0x2db   :  { %s524_s29 = scalar_lea.vmem %s323_s5, 16  ;;  %s528_s30 = scalar_lea.vmem %s323_s5, 128 }
 0x2dc   :  { %p525_p0 = scmp.ne.s32.totalorder %s323_s5, %s524_s29  ;;  %p529_p1 = scmp.lt.s32.totalorder %s323_s5, %s323_s5 }
 0x2dd   :  { %p530_p2 = scmp.lt.s32.totalorder %s528_s30, %s524_s29 }
 0x2df   :  { %p531_p3 = por %p530_p2, %p529_p1 }
 0x2e1   :  { %p532_p4 = pnand %p531_p3, %p525_p0 }
 0x2e3   :  { %535 = shalt.err (!%p532_p4)
}
 0x2e4   :  { %s536_s9 = scalar_lea.hbm %s757_s7, 16 }
 0x2e5   :  { %p537_p5 = scmp.ne.s32.totalorder %s757_s7, %s536_s9  ;;  %p540_p6 = scmp.lt.u32.totalorder %s536_s9, %s757_s7 }
 0x2e7   :  { %p542_p7 = pnand %p540_p6, %p537_p5 }
 0x2e9   :  { %545 = shalt.err (!%p542_p7)
}
 0x2ea   :  { %s552_s13 = smov 16   ;;  %s553_s14 = smov 1  }
 0x2eb   :  { %328 = dma.vmem_to_hbm [thread:$0]  %s323_s5, 16, %s757_s7, [#allocation3], %s552_s13, %s552_s13, %s553_s14  }
 0x2ec   :  { %546 = dma.done.wait [#allocation3], 128  }
 0x2ed   :  { %547 = vsyncadd [#allocation3], 4294967168 }
 0x2ee   :  { %332 = vsyncpa [#allocation3], 1 }

</bundles_post_ra>
